<compile_context>
chip_gen: v5e
topology: v5e:2x2
jax: 0.10.0
libtpu: 0.0.40
codegen_flags: <defaults>
</compile_context>

<pallas_src>
import jax
import jax.numpy as jnp
from jax.experimental import pallas as pl
from jax.experimental.pallas import tpu as pltpu

IN_FEATURES = 28 * 28   # 784
HIDDEN = 50
OUT_FEATURES = 2
DEFAULT_TB = 2048       # batch tile cap (double-buffered f32 x tile ~12.8 MB)


def _round_up(x, m):
    return ((x + m - 1) // m) * m


def _cdiv(a, b):
    return -(-a // b)


def _choose_batch_tiling(B, tb_cap):
    """Pick (TB, B_pad) so padding is <= a few sublanes and, for large batches,
    there are >= 2 grid steps (lets the 'parallel' axis use both v7x cores)."""
    steps = _cdiv(B, tb_cap)
    if steps < 2 and B >= 1024:
        steps = 2
    TB = _round_up(_cdiv(B, steps), 8)
    B_pad = _round_up(B, TB)
    return TB, B_pad


def _mlp_tanh_kernel(x_ref, w1_ref, b1_ref, w2_ref, b2_ref, o_ref):
    # x_ref:  (TB, 784) f32 (or bf16)   w1_ref: (784, 50) bf16   b1_ref: (1, 50) f32
    # w2_ref: (50, 2)  bf16             b2_ref: (1, 2) f32       o_ref:  (TB, 2) f32
    #
    # Cast the x tile to bf16 on the fly (VPU slack under the HBM-bound stream)
    # so fc1 runs on the MXU's native bf16 path with f32 accumulation.
    x = x_ref[...].astype(jnp.bfloat16)
    h = jnp.dot(x, w1_ref[...], preferred_element_type=jnp.float32) + b1_ref[...]
    h = jnp.tanh(h)                                  # EUP transcendental, f32
    # fc2 (50 -> 2): bf16 operands, f32 accumulation; tiny compared to fc1.
    y = jnp.dot(h.astype(jnp.bfloat16), w2_ref[...],
                preferred_element_type=jnp.float32) + b2_ref[...]
    o_ref[...] = y.astype(o_ref.dtype)


def simple_nn_tanh_forward(x, w1, b1, w2, b2, *, tb=DEFAULT_TB):
    """x: any shape whose trailing elements flatten to 784 per row (mirrors
    torch's x.view(-1, 784)).  w1: (784, 50), b1: (50,), w2: (50, 2), b2: (2,).
    Weights are stored pre-transposed (in_features, out_features)."""
    x2d = x.reshape(-1, IN_FEATURES)
    B = x2d.shape[0]

    TB, B_pad = _choose_batch_tiling(B, tb)
    if B_pad != B:
        # Junk rows (< one sublane group per grid step) are computed and then
        # sliced off below.
        x2d = jnp.pad(x2d, ((0, B_pad - B), (0, 0)))

    # NOTE: x is NOT cast here -- the kernel converts to bf16 in VMEM so the x
    # stream is read from HBM exactly once, in its producer dtype.
    w1_bf16 = w1.astype(jnp.bfloat16)                        # (784, 50), resident
    b1_2d = b1.reshape(1, HIDDEN).astype(jnp.float32)        # (1, 50),   resident
    w2_bf16 = w2.astype(jnp.bfloat16)                        # (50, 2),   resident
    b2_2d = b2.reshape(1, OUT_FEATURES).astype(jnp.float32)  # (1, 2),    resident

    grid = (B_pad // TB,)

    x_bytes = x2d.dtype.itemsize
    vmem_limit = int(min(
        48 * 1024 * 1024,                   # stay under v7x's 64 MiB physical VMEM
        2 * TB * IN_FEATURES * x_bytes      # x tiles, double-buffered
        + 2 * TB * 128 * 4                  # out tiles (lane-padded in VMEM), x2
        + IN_FEATURES * 128 * 2             # w1 bf16 (lanes padded 50 -> 128)
        + 3 * 128 * 128 * 4                 # w2 / b1 / b2 (generous)
        + 4 * 1024 * 1024,                  # headroom for intermediates
    ))

    out = pl.pallas_call(
        _mlp_tanh_kernel,
        out_shape=jax.ShapeDtypeStruct((B_pad, OUT_FEATURES), jnp.float32),
        grid=grid,
        in_specs=[
            pl.BlockSpec((TB, IN_FEATURES), lambda i: (i, 0)),       # x tile
            pl.BlockSpec((IN_FEATURES, HIDDEN), lambda i: (0, 0)),   # w1 resident
            pl.BlockSpec((1, HIDDEN), lambda i: (0, 0)),             # b1 resident
            pl.BlockSpec((HIDDEN, OUT_FEATURES), lambda i: (0, 0)),  # w2 resident
            pl.BlockSpec((1, OUT_FEATURES), lambda i: (0, 0)),       # b2 resident
        ],
        out_specs=pl.BlockSpec((TB, OUT_FEATURES), lambda i: (i, 0)),
        compiler_params=pltpu.CompilerParams(
            dimension_semantics=("parallel",),
            vmem_limit_bytes=vmem_limit,
        ),
    )(x2d, w1_bf16, b1_2d, w2_bf16, b2_2d)

    return out if B == B_pad else out[:B]


def init_params(key):
    """Deterministic synthetic parameters matching nn.Linear shapes.
    Stored pre-transposed: w1 (784, 50), w2 (50, 2)."""
    k1, k2, k3, k4 = jax.random.split(key, 4)
    bound1 = 1.0 / jnp.sqrt(IN_FEATURES)
    bound2 = 1.0 / jnp.sqrt(HIDDEN)
    w1 = jax.random.uniform(k1, (IN_FEATURES, HIDDEN), jnp.float32, -bound1, bound1)
    b1 = jax.random.uniform(k2, (HIDDEN,), jnp.float32, -bound1, bound1)
    w2 = jax.random.uniform(k3, (HIDDEN, OUT_FEATURES), jnp.float32, -bound2, bound2)
    b2 = jax.random.uniform(k4, (OUT_FEATURES,), jnp.float32, -bound2, bound2)
    return w1, b1, w2, b2


if __name__ == "__main__":
    key = jax.random.PRNGKey(0)
    kx, kp = jax.random.split(key)

    # Small MNIST-like batch: (B, 1, 28, 28) NCHW, flattened inside the wrapper.
    B = 8
    x = jax.random.normal(kx, (B, 1, 28, 28), jnp.float32)
    w1, b1, w2, b2 = init_params(kp)

    out = simple_nn_tanh_forward(x, w1, b1, w2, b2)
    out = jax.block_until_ready(out)

    # Pure-JAX reference mirroring the kernel's precision choices:
    # bf16 inputs to both matmuls, f32 accumulation, f32 tanh/bias.
    x2d = x.reshape(-1, IN_FEATURES)
    x_bf = x2d.astype(jnp.bfloat16).astype(jnp.float32)
    w1_bf = w1.astype(jnp.bfloat16).astype(jnp.float32)
    h_ref = jnp.tanh(x_bf @ w1_bf + b1)
    y_ref = (h_ref.astype(jnp.bfloat16).astype(jnp.float32)
             @ w2.astype(jnp.bfloat16).astype(jnp.float32) + b2)

    assert out.shape == (B, OUT_FEATURES)
    assert jnp.allclose(out, y_ref, atol=2e-3, rtol=2e-3), (
        float(jnp.max(jnp.abs(out - y_ref))))

    print("KERNEL_OK")
</pallas_src>

<mosaic_0001>
module attributes {stable_mosaic.version = 11 : i64} {
  func.func @_mlp_tanh_kernel(%arg0: i32, %arg1: memref<8x784xf32, #tpu.memory_space<vmem>>, %arg2: memref<784x50xbf16, #tpu.memory_space<vmem>>, %arg3: memref<1x50xf32, #tpu.memory_space<vmem>>, %arg4: memref<50x2xbf16, #tpu.memory_space<vmem>>, %arg5: memref<1x2xf32, #tpu.memory_space<vmem>>, %arg6: memref<8x2xf32, #tpu.memory_space<vmem>>) attributes {dimension_semantics = [#tpu.dimension_semantics<parallel>], iteration_bounds = array<i64: 1>, scalar_prefetch = 0 : i64, scratch_operands = 0 : i64, tpu.core_type = #tpu.core_type<tc>, window_params = [{transform_indices = @transform_0, window_bounds = array<i64: 8, 784>}, {pipeline_mode = #tpu.pipeline_mode<synchronous>, transform_indices = @transform_1, window_bounds = array<i64: 784, 50>}, {pipeline_mode = #tpu.pipeline_mode<synchronous>, transform_indices = @transform_2, window_bounds = array<i64: 1, 50>}, {pipeline_mode = #tpu.pipeline_mode<synchronous>, transform_indices = @transform_3, window_bounds = array<i64: 50, 2>}, {pipeline_mode = #tpu.pipeline_mode<synchronous>, transform_indices = @transform_4, window_bounds = array<i64: 1, 2>}, {transform_indices = @transform_5, window_bounds = array<i64: 8, 2>}]} {
    %c0 = arith.constant 0 : index
    %c0_0 = arith.constant 0 : index
    %0 = vector.load %arg1[%c0, %c0_0] : memref<8x784xf32, #tpu.memory_space<vmem>>, vector<8x784xf32>
    %1 = arith.truncf %0 : vector<8x784xf32> to vector<8x784xbf16>
    %c0_1 = arith.constant 0 : index
    %c0_2 = arith.constant 0 : index
    %2 = vector.load %arg2[%c0_1, %c0_2] : memref<784x50xbf16, #tpu.memory_space<vmem>>, vector<784x50xbf16>
    %cst = arith.constant dense<0.000000e+00> : vector<8x50xf32>
    %3 = tpu.matmul %1, %2, %cst {dimension_numbers = #tpu.dot_dimension_numbers<[1], [0], [0], [1], [0, 0, 1, 1], [], []>} : vector<8x784xbf16>, vector<784x50xbf16>, vector<8x50xf32> -> vector<8x50xf32>
    %c0_3 = arith.constant 0 : index
    %c0_4 = arith.constant 0 : index
    %4 = vector.load %arg3[%c0_3, %c0_4] : memref<1x50xf32, #tpu.memory_space<vmem>>, vector<1x50xf32>
    %5 = vector.broadcast %4 : vector<1x50xf32> to vector<8x50xf32>
    %6 = arith.addf %3, %5 : vector<8x50xf32>
    %7 = math.tanh %6 : vector<8x50xf32>
    %8 = arith.truncf %7 : vector<8x50xf32> to vector<8x50xbf16>
    %c0_5 = arith.constant 0 : index
    %c0_6 = arith.constant 0 : index
    %9 = vector.load %arg4[%c0_5, %c0_6] : memref<50x2xbf16, #tpu.memory_space<vmem>>, vector<50x2xbf16>
    %cst_7 = arith.constant dense<0.000000e+00> : vector<8x2xf32>
    %10 = tpu.matmul %8, %9, %cst_7 {dimension_numbers = #tpu.dot_dimension_numbers<[1], [0], [0], [1], [0, 0, 1, 1], [], []>} : vector<8x50xbf16>, vector<50x2xbf16>, vector<8x2xf32> -> vector<8x2xf32>
    %c0_8 = arith.constant 0 : index
    %c0_9 = arith.constant 0 : index
    %11 = vector.load %arg5[%c0_8, %c0_9] : memref<1x2xf32, #tpu.memory_space<vmem>>, vector<1x2xf32>
    %12 = vector.broadcast %11 : vector<1x2xf32> to vector<8x2xf32>
    %13 = arith.addf %10, %12 : vector<8x2xf32>
    %c0_10 = arith.constant 0 : index
    %c0_11 = arith.constant 0 : index
    %14 = vector.load %arg6[%c0_10, %c0_11] : memref<8x2xf32, #tpu.memory_space<vmem>>, vector<8x2xf32>
    tpu.vector_store %arg6[%c0_10, %c0_11], %13 {strides = array<i32>} : memref<8x2xf32, #tpu.memory_space<vmem>>, vector<8x2xf32>,
    return
  }
  func.func @transform_0(%arg0: i32) -> (i32, i32) {
    %c0_i32 = arith.constant 0 : i32
    %c0_i32_0 = arith.constant 0 : i32
    return %arg0, %c0_i32 : i32, i32
  }
  func.func @transform_1(%arg0: i32) -> (i32, i32) {
    %c0_i32 = arith.constant 0 : i32
    %c0_i32_0 = arith.constant 0 : i32
    %c0_i32_1 = arith.constant 0 : i32
    return %c0_i32, %c0_i32_0 : i32, i32
  }
  func.func @transform_2(%arg0: i32) -> (i32, i32) {
    %c0_i32 = arith.constant 0 : i32
    %c0_i32_0 = arith.constant 0 : i32
    %c0_i32_1 = arith.constant 0 : i32
    return %c0_i32, %c0_i32_0 : i32, i32
  }
  func.func @transform_3(%arg0: i32) -> (i32, i32) {
    %c0_i32 = arith.constant 0 : i32
    %c0_i32_0 = arith.constant 0 : i32
    %c0_i32_1 = arith.constant 0 : i32
    return %c0_i32, %c0_i32_0 : i32, i32
  }
  func.func @transform_4(%arg0: i32) -> (i32, i32) {
    %c0_i32 = arith.constant 0 : i32
    %c0_i32_0 = arith.constant 0 : i32
    %c0_i32_1 = arith.constant 0 : i32
    return %c0_i32, %c0_i32_0 : i32, i32
  }
  func.func @transform_5(%arg0: i32) -> (i32, i32) {
    %c0_i32 = arith.constant 0 : i32
    %c0_i32_0 = arith.constant 0 : i32
    return %arg0, %c0_i32 : i32, i32
  }
}

</mosaic_0001>

<bundles_post_ra>
// kernel: tpu_custom_call.1
= control target key start
LH: loop header
LB: loop body
LE: loop exit
PB: predicated region body
PF: predicated region fallthrough
CT: control target
= control target key end

     0   :  { %vm431_vm0 = vcmask 130048   ;;  %vm564_vm1 = vcmask 1040384   ;;  %vm560_vm2 = vcmask 408576   ;;  %vm581_vm3 = vcmask 15360   ;;  %s1072_s1 = inlined_call_operand.vmem [shape: bf16[784,50], index: 1, kind: input, shape index: {}]   ;;  %s1073_s2 = inlined_call_operand.vmem [shape: f32[1,50], index: 2, kind: input, shape index: {}]   ;;  %s1074_s0 = inlined_call_operand.vmem [shape: f32[8,784], index: 0, kind: input, shape index: {}]   ;;  %s1075_s4 = inlined_call_operand.vmem [shape: f32[1,2], index: 4, kind: input, shape index: {}]   ;;  %s1076_s3 = inlined_call_operand.vmem [shape: bf16[50,2], index: 3, kind: input, shape index: {}]   ;;  %s1077_s5 = inlined_call_operand.vmem [shape: f32[8,2], index: 5, kind: output, shape index: {}]  }
   0x1   :  { %v804_v0 = vld [vmem:[%s1072_s1 + $0x38] sm:$0xff]  ;;  %v803_v3 = vld [vmem:[%s1072_s1 + $0x30] sm:$0xff]  ;;  %v802_v8 = vld [vmem:[%s1072_s1 + $0x28] sm:$0xff] }
   0x2   :  { %v812_v1 = vld [vmem:[%s1072_s1 + $0x78] sm:$0xff]  ;;  %435 = vmatpush.bf16.msra.mxu0 %v804_v0  ;;  %v811_v4 = vld [vmem:[%s1072_s1 + $0x70] sm:$0xff]  ;;  %v810_v9 = vld [vmem:[%s1072_s1 + $0x68] sm:$0xff] }
   0x3   :  { %v820_v2 = vld [vmem:[%s1072_s1 + $0xb8] sm:$0xff]  ;;  %448 = vmatpush.bf16.msra.mxu1 %v812_v1  ;;  %v819_v5 = vld [vmem:[%s1072_s1 + $0xb0] sm:$0xff]  ;;  %v818_v10 = vld [vmem:[%s1072_s1 + $0xa8] sm:$0xff] }
   0x4   :  { %461 = vmatpush.bf16.msra.mxu2 %v820_v2  ;;  %v828_v6 = vld [vmem:[%s1072_s1 + $0xf8] sm:$0xff]  ;;  %v827_v7 = vld [vmem:[%s1072_s1 + $0xf0] sm:$0xff]  ;;  %v826_v11 = vld [vmem:[%s1072_s1 + $0xe8] sm:$0xff] }
   0x5   :  { %474 = vmatpush.bf16.msra.mxu3 %v828_v6  ;;  %v801_v12 = vld [vmem:[%s1072_s1 + $0x20] sm:$0xff]  ;;  %v800_v16 = vld [vmem:[%s1072_s1 + $0x18] sm:$0xff]  ;;  %v799_v20 = vld [vmem:[%s1072_s1 + $0x10] sm:$0xff] }
   0x6   :  { %436 = vmatpush.bf16.msra.mxu0 %v803_v3  ;;  %v809_v13 = vld [vmem:[%s1072_s1 + $0x60] sm:$0xff]  ;;  %v808_v17 = vld [vmem:[%s1072_s1 + $0x58] sm:$0xff]  ;;  %v807_v21 = vld [vmem:[%s1072_s1 + $0x50] sm:$0xff] }
   0x7   :  { %449 = vmatpush.bf16.msra.mxu1 %v811_v4  ;;  %v817_v14 = vld [vmem:[%s1072_s1 + $0xa0] sm:$0xff]  ;;  %v816_v18 = vld [vmem:[%s1072_s1 + $0x98] sm:$0xff]  ;;  %v815_v22 = vld [vmem:[%s1072_s1 + $0x90] sm:$0xff] }
   0x8   :  { %462 = vmatpush.bf16.msra.mxu2 %v819_v5  ;;  %v825_v15 = vld [vmem:[%s1072_s1 + $0xe0] sm:$0xff]  ;;  %v824_v19 = vld [vmem:[%s1072_s1 + $0xd8] sm:$0xff]  ;;  %v823_v23 = vld [vmem:[%s1072_s1 + $0xd0] sm:$0xff] }
   0x9   :  { %475 = vmatpush.bf16.msra.mxu3 %v827_v7  ;;  %v798_v24 = vld [vmem:[%s1072_s1 + $0x8] sm:$0xff]  ;;  %v797_v27 = vld [vmem:[%s1072_s1] sm:$0xff]  ;;  %v836_v32 = vld [vmem:[%s1072_s1 + $0x138] sm:$0xff] }
   0xa   :  { %437 = vmatpush.bf16.msra.mxu0 %v802_v8  ;;  %v806_v25 = vld [vmem:[%s1072_s1 + $0x48] sm:$0xff]  ;;  %v805_v29 = vld [vmem:[%s1072_s1 + $0x40] sm:$0xff]  ;;  %v844_v33 = vld [vmem:[%s1072_s1 + $0x178] sm:$0xff] }
   0xb   :  { %450 = vmatpush.bf16.msra.mxu1 %v810_v9  ;;  %v814_v26 = vld [vmem:[%s1072_s1 + $0x88] sm:$0xff]  ;;  %v21_v30 = vld [vmem:[%s1074_s0] sm:$0xff]  ;;  %v23_v35 = vld [vmem:[%s1074_s0 + $0x10] sm:$0xff] }
   0xc   :  { %463 = vmatpush.bf16.msra.mxu2 %v818_v10  ;;  %v822_v28 = vld [vmem:[%s1072_s1 + $0xc8] sm:$0xff]  ;;  %v813_v34 = vld [vmem:[%s1072_s1 + $0x80] sm:$0xff]  ;;  %v28_v36 = vpack.c.bf16 %v21_v30, %v21_v30  ;;  %v24_v40 = vld [vmem:[%s1074_s0 + $0x18] sm:$0xff]  ;;  %v30_v43 = vpack.c.bf16 %v23_v35, %v23_v35 }
   0xd   :  { %476 = vmatpush.bf16.msra.mxu3 %v826_v11  ;;  %v22_v31 = vld [vmem:[%s1074_s0 + $0x8] sm:$0xff]  ;;  %v821_v38 = vld [vmem:[%s1072_s1 + $0xc0] sm:$0xff]  ;;  %v835_v41 = vld [vmem:[%s1072_s1 + $0x130] sm:$0xff]  ;;  %v31_v44 = vpack.c.bf16 %v24_v40, %v24_v40 }
   0xe   :  { %438 = vmatpush.bf16.msra.mxu0 %v801_v12  ;;  %v29_v37 = vpack.c.bf16 %v22_v31, %v22_v31  ;;  %v845_v39 = vld [vmem:[%s1072_s1 + $0x180] sm:$0xff]  ;;  %v843_v42 = vld [vmem:[%s1072_s1 + $0x170] sm:$0xff]  ;;  %v834_v45 = vld [vmem:[%s1072_s1 + $0x128] sm:$0xff] }
   0xf   :  { %451 = vmatpush.bf16.msra.mxu1 %v809_v13  ;;  %v842_v46 = vld [vmem:[%s1072_s1 + $0x168] sm:$0xff]  ;;  %v833_v47 = vld [vmem:[%s1072_s1 + $0x120] sm:$0xff]  ;;  %v832_v49 = vld [vmem:[%s1072_s1 + $0x118] sm:$0xff] }
  0x10   :  { %464 = vmatpush.bf16.msra.mxu2 %v817_v14  ;;  %v841_v48 = vld [vmem:[%s1072_s1 + $0x160] sm:$0xff]  ;;  %v840_v50 = vld [vmem:[%s1072_s1 + $0x158] sm:$0xff]  ;;  %v27_v51 = vld [vmem:[%s1074_s0 + $0x30] sm:$0xff] }
  0x11   :  { %477 = vmatpush.bf16.msra.mxu3 %v825_v15  ;;  %v831_v52 = vld [vmem:[%s1072_s1 + $0x110] sm:$0xff]  ;;  %v34_v54 = vpack.c.bf16 %v27_v51, %v27_v51  ;;  %v830_v55 = vld [vmem:[%s1072_s1 + $0x108] sm:$0xff]  ;;  %v829_v57 = vld [vmem:[%s1072_s1 + $0x100] sm:$0xff] }
  0x12   :  { %439 = vmatpush.bf16.msra.mxu0 %v800_v16  ;;  %v839_v53 = vld [vmem:[%s1072_s1 + $0x150] sm:$0xff]  ;;  %v838_v56 = vld [vmem:[%s1072_s1 + $0x148] sm:$0xff]  ;;  %v837_v58 = vld [vmem:[%s1072_s1 + $0x140] sm:$0xff] }
  0x13   :  { %452 = vmatpush.bf16.msra.mxu1 %v808_v17  ;;  %v25_v59 = vld [vmem:[%s1074_s0 + $0x20] sm:$0xff]  ;;  %v26_v60 = vld [vmem:[%s1074_s0 + $0x28] sm:$0xff]  ;;  %v534_v63 = vld [vmem:[%s1076_s3 + $0x18] sm:$0x1] }
  0x14   :  { %465 = vmatpush.bf16.msra.mxu2 %v816_v18  ;;  %v32_v61 = vpack.c.bf16 %v25_v59, %v25_v59  ;;  %v33_v62 = vpack.c.bf16 %v26_v60, %v26_v60  ;;  %v552_v0 = vunpack.c.l.b16 %v534_v63  ;;  %v848_v5 = vld [vmem:[%s1076_s3 + $0x10] sm:$0xff]  ;;  %v847_v6 = vld [vmem:[%s1076_s3 + $0x8] sm:$0xff]  ;;  %v846_v9 = vld [vmem:[%s1076_s3] sm:$0xff] }
  0x15   :  { %478 = vmatpush.bf16.msra.mxu3 %v824_v19  ;;  %v849_v12 = vld [vmem:[%s1073_s2] ss:$0 sm:$0xff] }
  0x16   :  { %440 = vmatpush.bf16.msra.mxu0 %v799_v20  ;;  %v556_v1 = vpack.c.b16 %v552_v0, %v552_v0  ;;  %v850_v30 = vld [vmem:[%s1075_s4] ss:$0 sm:$0xff] }
  0x17   :  { %453 = vmatpush.bf16.msra.mxu1 %v807_v21 }
  0x18   :  { %466 = vmatpush.bf16.msra.mxu2 %v815_v22  ;;  %v566_v2 = vsel %vm564_vm1, %v556_v1, 0 }
  0x19   :  { %479 = vmatpush.bf16.msra.mxu3 %v823_v23 }
  0x1a   :  { %441 = vmatpush.bf16.msra.mxu0 %v798_v24 }
  0x1b   :  { %454 = vmatpush.bf16.msra.mxu1 %v806_v25 }
  0x1c   :  { %467 = vmatpush.bf16.msra.mxu2 %v814_v26 }
  0x1d   :  { %480 = vmatpush.bf16.msra.mxu3 %v822_v28 }
  0x1e   :  { %442 = vmatpush.bf16.msra.mxu0 %v797_v27 }
  0x1f   :  { %455 = vmatpush.bf16.msra.mxu1 %v805_v29 }
  0x20   :  { %468 = vmatpush.bf16.msra.mxu2 %v813_v34 }
  0x21   :  { %443 = vmatmul.bf16.vlgmr.msra.gmra.mxu0 %v28_v36  ;;  %481 = vmatpush.bf16.msra.mxu3 %v821_v38 }
  0x22   :  { %487 = vmatpush.bf16.msrb.mxu0 %v836_v32  ;;  %456 = vmatmul.bf16.vlgmr.msra.gmra.mxu1 %v29_v37 }
  0x23   :  { %500 = vmatpush.bf16.msrb.mxu1 %v844_v33  ;;  %469 = vmatmul.bf16.vlgmr.msra.gmra.mxu2 %v30_v43 }
  0x24   :  { %520 = vmatpush.bf16.msrb.mxu2 %v845_v39  ;;  %482 = vmatmul.bf16.vlgmr.msra.gmra.mxu3 %v31_v44 }
  0x25   :  { %572 = vmatpush.bf16.msrb.mxu3 %v566_v2 }
  0x26   :  { %488 = vmatpush.bf16.msrb.mxu0 %v835_v41 }
  0x27   :  { %501 = vmatpush.bf16.msrb.mxu1 %v843_v42 }
  0x29   :  { %573 = vmatpush.bf16.msrb.mxu3 %v848_v5 }
  0x2a   :  { %489 = vmatpush.bf16.msrb.mxu0 %v834_v45 }
  0x2b   :  { %502 = vmatpush.bf16.msrb.mxu1 %v842_v46 }
  0x2d   :  { %574 = vmatpush.bf16.msrb.mxu3 %v847_v6 }
  0x2e   :  { %490 = vmatpush.bf16.msrb.mxu0 %v833_v47 }
  0x2f   :  { %503 = vmatpush.bf16.msrb.mxu1 %v841_v48 }
  0x31   :  { %575 = vmatpush.bf16.msrb.mxu3 %v846_v9 }
  0x32   :  { %491 = vmatpush.bf16.msrb.mxu0 %v832_v49 }
  0x33   :  { %504 = vmatpush.bf16.msrb.mxu1 %v840_v50  ;;  %783 = vmatmul.msk.bf16.vlgmr.msrb.gmra.mxu2 %vm431_vm0, %v34_v54 }
  0x36   :  { %492 = vmatpush.bf16.msrb.mxu0 %v831_v52 }
  0x37   :  { %505 = vmatpush.bf16.msrb.mxu1 %v839_v53 }
  0x3a   :  { %493 = vmatpush.bf16.msrb.mxu0 %v830_v55 }
  0x3b   :  { %506 = vmatpush.bf16.msrb.mxu1 %v838_v56 }
  0x3e   :  { %494 = vmatpush.bf16.msrb.mxu0 %v829_v57 }
  0x3f   :  { %507 = vmatpush.bf16.msrb.mxu1 %v837_v58 }
  0x41   :  { %495 = vmatmul.bf16.vlgmr.msrb.gmra.mxu0 %v32_v61 }
  0x42   :  { %508 = vmatmul.bf16.vlgmr.msrb.gmra.mxu1 %v33_v62 }
  0x9e   :  { %v444_v3 = vpop.f32.mrf.mxu0 }
  0x9f   :  { %v457_v4 = vpop.f32.mrf.mxu1  ;;  %v445_v13 = vadd.f32 %v849_v12, %v444_v3 }
  0xa1   :  { %v458_v16 = vadd.f32 %v457_v4, %v445_v13 }
  0xa6   :  { %v446_v7 = vpop.f32.mrf.mxu0  ;;  %v470_v10 = vpop.f32.mrf.mxu2 }
  0xa7   :  { %v459_v8 = vpop.f32.mrf.mxu1  ;;  %v483_v11 = vpop.f32.mrf.mxu3  ;;  %v471_v17 = vadd.f32 %v470_v10, %v458_v16 }
  0xa9   :  { %v484_v19 = vadd.f32 %v483_v11, %v471_v17 }
  0xae   :  { %v472_v14 = vpop.f32.mrf.mxu2 }
  0xaf   :  { %v485_v15 = vpop.f32.mrf.mxu3 }
  0xb6   :  { %v522_v18 = vpop.f32.mrf.mxu2 }
  0xbe   :  { %v496_v20 = vpop.f32.mrf.mxu0  ;;  %v524_v24 = vpop.f32.mrf.mxu2 }
  0xbf   :  { %v509_v21 = vpop.f32.mrf.mxu1  ;;  %v497_v22 = vadd.f32 %v496_v20, %v484_v19 }
  0xc1   :  { %v510_v23 = vadd.f32 %v509_v21, %v497_v22 }
  0xc3   :  { %v523_v25 = vadd.f32 %v522_v18, %v510_v23 }
  0xc5   :  { %851 = vtanh.f32 %v523_v25 }
  0xc6   :  { %v498_v26 = vpop.f32.mrf.mxu0 }
  0xc7   :  { %v511_v27 = vpop.f32.mrf.mxu1 }
  0xcb   :  { %v852_v28 = vpop.eup %851 }
  0xcc   :  { %v527_v29 = vpack.c.bf16 %v852_v28, %v852_v28 }
  0xce   :  { %796 = vmatmul.msk.bf16.vlgmr.msrb.gmra.mxu3 %vm560_vm2, %v527_v29 }
 0x151   :  { %v577_v31 = vpop.f32.mrf.mxu3 }
 0x152   :  { %v578_v32 = vadd.f32 %v850_v30, %v577_v31 }
 0x154   :  { %582 = vst.msk [vmem:[%s1077_s5] sm:$0xff] %vm581_vm3, %v578_v32 }
 0x159   :  { %v579_v33 = vpop.f32.mrf.mxu3 }

</bundles_post_ra>
